<compile_context>
chip_gen: v5e
topology: v5e:2x2
jax: 0.10.0
libtpu: 0.0.40
codegen_flags: <defaults>
</compile_context>

<pallas_src>
import jax
import jax.numpy as jnp
from jax.experimental import pallas as pl
from jax.experimental.pallas import tpu as pltpu


# Per-tile VMEM budget (per buffer). Double-buffered input + output =>
# 4 * _MAX_TILE_BYTES = 16 MiB of tile buffers; we raise the scoped VMEM
# limit to 32 MiB explicitly so this also compiles on v5e (16 MiB default).
_MAX_TILE_BYTES = 4 * 1024 * 1024
_VMEM_LIMIT_BYTES = 32 * 1024 * 1024
_MAX_LANE = 2048
_PAD_LANE = 1024  # fallback lane width for total % 128 != 0 (rare)


# ----------------------------------------------------------------------------
# Pallas kernel: phi(x) = elu(x) + 1 == where(x > 0, x + 1, exp(x))
# ----------------------------------------------------------------------------
def _elu1_kernel(x_ref, o_ref):
    # Upcast to f32 for the math (free on an HBM-bound op), store in out dtype.
    x = x_ref[...].astype(jnp.float32)
    o_ref[...] = jnp.where(x > 0, x + 1.0, jnp.exp(x)).astype(o_ref.dtype)


def _elu_feature_map_2d(x2d, row_tile):
    """x2d: (rows, lane). Returns elu(x2d) + 1, tiled (row_tile, lane)."""
    rows, lane = x2d.shape
    grid = (pl.cdiv(rows, row_tile),)
    return pl.pallas_call(
        _elu1_kernel,
        out_shape=jax.ShapeDtypeStruct((rows, lane), x2d.dtype),
        grid_spec=pltpu.PrefetchScalarGridSpec(
            num_scalar_prefetch=0,
            grid=grid,
            in_specs=[pl.BlockSpec((row_tile, lane), lambda i: (i, 0))],
            out_specs=pl.BlockSpec((row_tile, lane), lambda i: (i, 0)),
        ),
        compiler_params=pltpu.CompilerParams(
            dimension_semantics=("parallel",),
            vmem_limit_bytes=_VMEM_LIMIT_BYTES,
        ),
    )(x2d)


def _pick_layout(shape, dtype):
    """Choose a lane-dense (rows, lane) flattening and a row tile.

    lane: largest multiple of 128 (<= _MAX_LANE) dividing the element count;
          returns None if the element count is not a multiple of 128
          (caller takes the padded path).
    row_tile: multiple of the dtype's sublane-pack size, capped so one tile
          buffer stays <= _MAX_TILE_BYTES, and chosen so the grid has at
          least 2 (and an even number of) steps whenever the tensor is big
          enough -- keeps both v7x TensorCores busy.
    """
    total = 1
    for s in shape:
        total *= s

    lane = None
    for cand in range(_MAX_LANE, 127, -128):
        if total % cand == 0:
            lane = cand
            break
    if lane is None:
        return None

    rows = total // lane
    itemsize = jnp.dtype(dtype).itemsize
    sub = max(8, 32 // itemsize)  # 8 for f32, 16 for bf16, 32 for int8/fp8
    max_rows = max(sub, (_MAX_TILE_BYTES // (lane * itemsize)) // sub * sub)

    if rows < 2 * sub:
        # Too small to split usefully; single (or few) blocks.
        return rows, lane, min(rows, max_rows)

    steps = -(-rows // max_rows)  # cdiv
    steps = max(steps, 2)         # >= 2 steps so v7x's 2nd TC gets work
    if steps % 2:
        steps += 1                # even grid length -> balanced TC split
    row_tile = -(-rows // steps)
    row_tile = -(-row_tile // sub) * sub  # round up to pack boundary
    return rows, lane, row_tile


def _elu_feature_map_impl(x):
    shape = x.shape
    layout = _pick_layout(shape, x.dtype)
    if layout is not None:
        rows, lane, row_tile = layout
        # Pure metadata reshape (row-major flatten) under jit -> no HBM copy.
        y2d = _elu_feature_map_2d(x.reshape(rows, lane), row_tile)
        return y2d.reshape(shape)

    # Rare path: total element count not a multiple of 128. Pad the flat view
    # so stores stay >=128-lane unmasked; the pad/slice copy is the price of
    # correctness for odd shapes.
    total = x.size
    padded = -(-total // _PAD_LANE) * _PAD_LANE
    xf = jnp.pad(x.reshape(-1), (0, padded - total))
    rows, lane, row_tile = _pick_layout((padded,), x.dtype)
    yf = _elu_feature_map_2d(xf.reshape(rows, lane), row_tile)
    return yf.reshape(-1)[:total].reshape(shape)


_elu_feature_map = jax.jit(_elu_feature_map_impl)


# ----------------------------------------------------------------------------
# Python-side module mirroring the PyTorch `Kernel` interface
# ----------------------------------------------------------------------------
class Kernel:
    """FeatureMap interface (JAX/Pallas port of the PyTorch base class)."""

    def __init__(self, head_size):
        self.head_size = head_size

    def new_kernel(self):
        """Deterministic feature map: nothing random to resample."""
        return None

    def forward(self, x):
        """Encode x with phi(x) = elu(x) + 1.

        x: (batch, seq, heads, head_size). Symmetric feature map, so the same
        transform is used for queries and keys.
        """
        assert x.shape[-1] == self.head_size
        return _elu_feature_map(x)

    # symmetric feature map: queries and keys share the same encoding
    forward_queries = forward
    forward_keys = forward

    def __call__(self, x):
        return self.forward(x)

    @classmethod
    def factory(cls, *args, **kwargs):
        def inner(hidden_size):
            return cls(hidden_size, *args, **kwargs)
        return inner


# TODO(synk): the PyTorch base class leaves `forward` abstract; the concrete
# elu(x)+1 feature map implemented here is the standard symmetric subclass.


if __name__ == "__main__":
    key = jax.random.PRNGKey(0)

    # Small shape consistent with (batch, seq, heads, head_size)
    batch, seq, heads, head_size = 2, 8, 4, 32
    x = jax.random.normal(key, (batch, seq, heads, head_size), dtype=jnp.float32)

    feature_map = Kernel.factory()(head_size)
    y = feature_map(x)
    jax.block_until_ready(y)

    ref = jax.nn.elu(x) + 1.0
    assert y.shape == x.shape
    assert jnp.max(jnp.abs(y - ref)) < 1e-5

    # Also exercise the multi-block (>=2 grid steps) path used on bigger inputs.
    k2 = jax.random.PRNGKey(1)
    x2 = jax.random.normal(k2, (2, 64, 4, 64), dtype=jnp.float32)
    fm2 = Kernel.factory()(64)
    y2 = fm2(x2)
    jax.block_until_ready(y2)
    ref2 = jax.nn.elu(x2) + 1.0
    assert jnp.max(jnp.abs(y2 - ref2)) < 1e-5

    print("KERNEL_OK")
</pallas_src>

<mosaic_0001>
module attributes {stable_mosaic.version = 11 : i64} {
  func.func @_elu1_kernel(%arg0: i32, %arg1: memref<1x2048xf32, #tpu.memory_space<vmem>>, %arg2: memref<1x2048xf32, #tpu.memory_space<vmem>>) attributes {dimension_semantics = [#tpu.dimension_semantics<parallel>], iteration_bounds = array<i64: 1>, scalar_prefetch = 0 : i64, scratch_operands = 0 : i64, tpu.core_type = #tpu.core_type<tc>, window_params = [{transform_indices = @transform_0, window_bounds = array<i64: 1, 2048>}, {transform_indices = @transform_1, window_bounds = array<i64: 1, 2048>}]} {
    %c0 = arith.constant 0 : index
    %c0_0 = arith.constant 0 : index
    %0 = vector.load %arg1[%c0, %c0_0] : memref<1x2048xf32, #tpu.memory_space<vmem>>, vector<1x2048xf32>
    %cst = arith.constant 0.000000e+00 : f32
    %1 = vector.broadcast %cst : f32 to vector<1x2048xf32>
    %2 = arith.cmpf ogt, %0, %1 : vector<1x2048xf32>
    %cst_1 = arith.constant 1.000000e+00 : f32
    %3 = vector.broadcast %cst_1 : f32 to vector<1x2048xf32>
    %4 = arith.addf %0, %3 : vector<1x2048xf32>
    %5 = math.exp %0 : vector<1x2048xf32>
    %6 = arith.select %2, %4, %5 : vector<1x2048xi1>, vector<1x2048xf32>
    %c0_2 = arith.constant 0 : index
    %c0_3 = arith.constant 0 : index
    %7 = vector.load %arg2[%c0_2, %c0_3] : memref<1x2048xf32, #tpu.memory_space<vmem>>, vector<1x2048xf32>
    tpu.vector_store %arg2[%c0_2, %c0_3], %6 {strides = array<i32>} : memref<1x2048xf32, #tpu.memory_space<vmem>>, vector<1x2048xf32>,
    return
  }
  func.func @transform_0(%arg0: i32) -> (i32, i32) {
    %c0_i32 = arith.constant 0 : i32
    %c0_i32_0 = arith.constant 0 : i32
    return %arg0, %c0_i32 : i32, i32
  }
  func.func @transform_1(%arg0: i32) -> (i32, i32) {
    %c0_i32 = arith.constant 0 : i32
    %c0_i32_0 = arith.constant 0 : i32
    return %arg0, %c0_i32 : i32, i32
  }
}

</mosaic_0001>

<bundles_post_ra>
// kernel: _elu_feature_map_impl.1
= control target key start
LH: loop header
LB: loop body
LE: loop exit
PB: predicated region body
PF: predicated region fallthrough
CT: control target
= control target key end

     0   :  { %s52_s0 = inlined_call_operand.vmem [shape: f32[1,2048], index: 0, kind: input, shape index: {}]   ;;  %s53_s1 = inlined_call_operand.vmem [shape: f32[1,2048], index: 1, kind: output, shape index: {}]  }
   0x1   :  { %v8_v0 = vld [vmem:[%s52_s0] sm:$0xff]  ;;  %v9_v1 = vld [vmem:[%s52_s0 + $0x8] sm:$0xff] }
   0x2   :  { %v14_v2 = vmul.f32 1.442695, %v8_v0  ;;  %v16_v3 = vmul.f32 1.442695, %v9_v1  ;;  %v12_v4 = vadd.f32 1.0, %v8_v0  ;;  %vm10_vm0 = vcmp.gt.f32.partialorder %v8_v0, 0.0 }
   0x3   :  { %v13_v5 = vadd.f32 1.0, %v9_v1  ;;  %vm11_vm1 = vcmp.gt.f32.partialorder %v9_v1, 0.0 }
   0x4   :  { %26 = vpow2.f32 %v14_v2 }
   0x5   :  { %28 = vpow2.f32 %v16_v3 }
   0xa   :  { %v27_v6 = vpop.eup %26 }
   0xb   :  { %v29_v7 = vpop.eup %28  ;;  %v18_v8 = vsel %vm10_vm0, %v12_v4, %v27_v6 }
   0xc   :  { %20 = vst [vmem:[%s53_s1] sm:$0xff] %v18_v8  ;;  %v19_v9 = vsel %vm11_vm1, %v13_v5, %v29_v7 }
   0xd   :  { %21 = vst [vmem:[%s53_s1 + $0x8] sm:$0xff] %v19_v9 }

</bundles_post_ra>
